<compile_context>
chip_gen: v7x
topology: tpu7x:2x2x1
jax: 0.10.0
libtpu: 0.0.40
codegen_flags: <defaults>
</compile_context>

<pallas_src>
import functools

import jax
import jax.numpy as jnp
from jax import lax
from jax.experimental import pallas as pl
from jax.experimental.pallas import tpu as pltpu


def _gating_kernel(x_ref, w_ref, tril_ref, out_ref, *,
                   num_gates, expert_capacity, group_size, eps, threshold):
    """One grid step: x block (R, D) with R = block_b * n tokens -> out block (R, W)."""
    R, _ = x_ref.shape
    E = num_gates
    C = expert_capacity
    n = group_size
    bt = R // n
    W = out_ref.shape[-1]
    two_e = 2 * E
    cap_f = float(C)

    w = w_ref[...]            # (d, E) f32, resident across the grid
    tril = tril_ref[...]      # (n, n) bf16 strictly-lower-triangular, resident

    # Hoisted iotas (JAX does not CSE broadcast_in_dim).
    eidx = lax.broadcasted_iota(jnp.int32, (R, E), 1)
    eidx2 = lax.broadcasted_iota(jnp.int32, (R, two_e), 1)
    flat_iota = lax.broadcasted_iota(jnp.int32, (R, W), 1)

    # --- gating logits + softmax for ALL groups in one MXU call (kept f32: the
    #     threshold compare / equality-based argmax are precision sensitive) ---
    logits = jnp.dot(x_ref[...], w, preferred_element_type=jnp.float32)     # (R, E)
    logits = logits - jnp.max(logits, axis=-1, keepdims=True)
    ex = jnp.exp(logits)
    raw = ex / jnp.sum(ex, axis=-1, keepdims=True)                          # (R, E)

    # --- top-1 (argmax via first index attaining the max) ---
    gate_1 = jnp.max(raw, axis=-1, keepdims=True)                           # (R, 1)
    index_1 = jnp.min(jnp.where(raw == gate_1, eidx, E), axis=-1, keepdims=True)
    mask_1 = (eidx == index_1).astype(jnp.float32)                          # (R, E)

    # --- top-2: max of the remaining gates ---
    gates_wo1 = raw * (1.0 - mask_1)
    gate_2 = jnp.max(gates_wo1, axis=-1, keepdims=True)
    index_2 = jnp.min(jnp.where(gates_wo1 == gate_2, eidx, E), axis=-1, keepdims=True)

    # --- sequential renormalization (gate_2 uses the *updated* gate_1, as in torch) ---
    gate_1 = gate_1 / (gate_1 + gate_2 + eps)
    gate_2 = gate_2 / (gate_1 + gate_2 + eps)
    keep_2 = (gate_2 > threshold).astype(jnp.float32)                       # (R, 1)
    mask_2 = jnp.where(eidx == index_2, keep_2, 0.0)                        # (R, E)

    # --- per-group exclusive cumsum of [mask_1 | mask_2]: pack the groups along the
    #     lane axis and run ONE bf16 matmul (operands are exact 0/1 -> f32-accum exact).
    masks = (jnp.where(eidx2 == index_1, 1.0, 0.0)
             + jnp.where(eidx2 == index_2 + E, keep_2, 0.0))                # (R, 2E)
    if bt == 1:
        packed = masks                                                      # (n, 2E)
    else:
        packed = jnp.transpose(masks.reshape(bt, n, two_e),
                               (1, 0, 2)).reshape(n, bt * two_e)            # (n, bt*2E)
    csum_p = jnp.dot(tril, packed.astype(jnp.bfloat16),
                     preferred_element_type=jnp.float32)                    # (n, bt*2E)
    if bt == 1:
        csum = csum_p
    else:
        csum = jnp.transpose(csum_p.reshape(n, bt, two_e),
                             (1, 0, 2)).reshape(R, two_e)                   # (R, 2E)

    # --- expert-1 capacity ---
    pos_1 = csum[:, :E] * mask_1
    mask_1 = mask_1 * (pos_1 < cap_f).astype(jnp.float32)
    mask_1_flat = jnp.sum(mask_1, axis=-1, keepdims=True)                   # (R, 1) in {0,1}
    pos_1_flat = jnp.sum(pos_1, axis=-1, keepdims=True)
    gate_1 = gate_1 * mask_1_flat

    # per-group occupancy of route 1 (post-capacity), broadcast back to each token row
    if bt == 1:
        mask_1_count = jnp.sum(mask_1, axis=0, keepdims=True)               # (1, E)
    else:
        m3 = mask_1.reshape(bt, n, E)
        mask_1_count = jnp.broadcast_to(jnp.sum(m3, axis=1, keepdims=True),
                                        (bt, n, E)).reshape(R, E)           # (R, E)

    # --- expert-2 capacity (offset by route-1 occupancy) ---
    pos_2 = (csum[:, E:] + mask_1_count) * mask_2
    mask_2 = mask_2 * (pos_2 < cap_f).astype(jnp.float32)
    mask_2_flat = jnp.sum(mask_2, axis=-1, keepdims=True)
    pos_2_flat = jnp.sum(pos_2, axis=-1, keepdims=True)
    gate_2 = gate_2 * mask_2_flat

    # --- lane-dense routing slab (R, W): fused nested select over a combined
    #     (expert, slot) one-hot. Dropped tokens get sentinel target -1 so a stray
    #     slot can never shadow a valid one. ---
    tgt_1 = jnp.where(mask_1_flat > 0.0, index_1 * C + pos_1_flat.astype(jnp.int32), -1)
    tgt_2 = jnp.where(mask_2_flat > 0.0, index_2 * C + pos_2_flat.astype(jnp.int32), -1)
    out_ref[...] = jnp.where(flat_iota == tgt_1, gate_1,
                             jnp.where(flat_iota == tgt_2, gate_2, 0.0))


def top2_threshold_gating(x, gating_weights, *, num_gates, eps=1e-9, threshold=0.2,
                          capacity_factor_tuple=(1.25, 2.0), training=True,
                          minimum_expert=4, block_b=None):
    b, n, d = x.shape
    E = num_gates
    assert gating_weights.shape == (d, E)
    cap_factor = capacity_factor_tuple[0 if training else 1]
    C = max(min(n, int(n * cap_factor / E)), minimum_expert)
    W = ((E * C + 127) // 128) * 128          # lane-dense padded slab width (>=128)

    # Device-aware VMEM budgeting.
    try:
        vmem_cap = int(pltpu.get_tpu_info().vmem_capacity_bytes)
    except Exception:
        vmem_cap = 64 * 1024 * 1024           # conservative (v7x per-TC) fallback

    fixed_bytes = 2 * (n * n * 2) + 2 * (d * E * 4)            # tril (bf16) + w, double-buffered
    per_group_bytes = 4 * n * (2 * d + 4 * W + 4 * E)          # x/out blocks + working set
    budget = max(int(0.5 * vmem_cap) - fixed_bytes, per_group_bytes)

    if block_b is None:
        def pick(require_two_steps):
            best = 0
            for cand in range(1, min(b, 16) + 1):
                if b % cand:
                    continue
                if require_two_steps and b > 1 and b // cand < 2:
                    continue                                   # keep >=2 steps for v7x's 2 TCs
                if (cand * n) % 8 and cand != b:
                    continue                                   # sublane alignment of row block
                if cand * per_group_bytes > budget:
                    continue
                best = cand
            return best
        block_b = pick(True) or pick(False) or 1
    while b % block_b:
        block_b -= 1

    R = block_b * n

    # Strictly-lower-triangular (n, n) matrix for the exclusive cumsum; bf16 is exact
    # for 0/1 and halves the resident VMEM. Constant index_map -> fetched once.
    tril = jnp.tril(jnp.ones((n, n), jnp.bfloat16), k=-1)
    x2 = x.reshape(b * n, d)

    kernel = functools.partial(
        _gating_kernel, num_gates=E, expert_capacity=C, group_size=n,
        eps=eps, threshold=threshold)

    need = fixed_bytes + block_b * per_group_bytes + (4 << 20)
    vmem_limit = int(min(0.85 * vmem_cap, max(need, 32 * 1024 * 1024)))

    out_flat = pl.pallas_call(
        kernel,
        out_shape=jax.ShapeDtypeStruct((b * n, W), jnp.float32),
        grid_spec=pltpu.PrefetchScalarGridSpec(
            num_scalar_prefetch=0,
            grid=(b // block_b,),
            in_specs=[
                pl.BlockSpec((R, d), lambda i: (i, 0)),
                pl.BlockSpec((d, E), lambda i: (0, 0)),
                pl.BlockSpec((n, n), lambda i: (0, 0)),
            ],
            out_specs=pl.BlockSpec((R, W), lambda i: (i, 0)),
        ),
        compiler_params=pltpu.CompilerParams(
            dimension_semantics=("parallel",),     # independent groups -> megacore-shardable
            vmem_limit_bytes=vmem_limit,
        ),
    )(x2, gating_weights, tril)

    # Slice off the lane padding and restore the module's (B, N, E, C) layout (free reshapes).
    return out_flat.reshape(b, n, W)[..., :E * C].reshape(b, n, E, C)


def _reference(x, w, *, num_gates, eps, threshold, expert_capacity):
    """Pure-JAX replica of the PyTorch forward, for verification."""
    raw = jax.nn.softmax(jnp.einsum('bnd,de->bne', x, w), axis=-1)
    index_1 = jnp.argmax(raw, axis=-1)
    gate_1 = jnp.max(raw, axis=-1)
    mask_1 = jax.nn.one_hot(index_1, num_gates, dtype=jnp.float32)
    gw1 = raw * (1.0 - mask_1)
    index_2 = jnp.argmax(gw1, axis=-1)
    gate_2 = jnp.max(gw1, axis=-1)
    mask_2 = jax.nn.one_hot(index_2, num_gates, dtype=jnp.float32)
    gate_1 = gate_1 / (gate_1 + gate_2 + eps)
    gate_2 = gate_2 / (gate_1 + gate_2 + eps)
    mask_2 = mask_2 * (gate_2 > threshold)[..., None].astype(jnp.float32)
    cap = float(expert_capacity)
    pos_1 = (jnp.cumsum(mask_1, axis=-2) - mask_1) * mask_1
    mask_1 = mask_1 * (pos_1 < cap).astype(jnp.float32)
    mask_1_flat = mask_1.sum(-1)
    pos_1f = pos_1.sum(-1)
    gate_1 = gate_1 * mask_1_flat
    m1_count = mask_1.sum(-2, keepdims=True)
    pos_2 = ((jnp.cumsum(mask_2, axis=-2) - mask_2) + m1_count) * mask_2
    mask_2 = mask_2 * (pos_2 < cap).astype(jnp.float32)
    mask_2_flat = mask_2.sum(-1)
    pos_2f = pos_2.sum(-1)
    gate_2 = gate_2 * mask_2_flat
    oh_p1 = jax.nn.one_hot(pos_1f.astype(jnp.int32), expert_capacity, dtype=jnp.float32)
    oh_p2 = jax.nn.one_hot(pos_2f.astype(jnp.int32), expert_capacity, dtype=jnp.float32)
    oh_e1 = jax.nn.one_hot(index_1, num_gates, dtype=jnp.float32)
    oh_e2 = jax.nn.one_hot(index_2, num_gates, dtype=jnp.float32)
    rt1 = (gate_1 * mask_1_flat)[..., None, None] * oh_e1[..., None] * oh_p1[..., None, :]
    rt2 = (gate_2 * mask_2_flat)[..., None, None] * oh_e2[..., None] * oh_p2[..., None, :]
    return rt1 + rt2


if __name__ == "__main__":
    B, N, D, E = 2, 16, 32, 8          # batch groups, group_size, dim, num_gates
    key = jax.random.PRNGKey(0)
    kx, kw = jax.random.split(key)
    x = jax.random.normal(kx, (B, N, D), dtype=jnp.float32)
    gating_weights = jax.random.normal(kw, (D, E), dtype=jnp.float32)  # torch.randn(dim, num_gates)

    training = True  # nn.Module default mode -> capacity_factor = 1.25
    cap_factor = (1.25, 2.0)[0 if training else 1]
    expert_capacity = max(min(N, int(N * cap_factor / E)), 4)

    out = top2_threshold_gating(x, gating_weights, num_gates=E, training=training)
    out = jax.block_until_ready(out)

    ref = _reference(x, gating_weights, num_gates=E, eps=1e-9, threshold=0.2,
                     expert_capacity=expert_capacity)
    assert out.shape == (B, N, E, expert_capacity), out.shape
    assert jnp.allclose(out, ref, rtol=1e-5, atol=1e-5), float(jnp.max(jnp.abs(out - ref)))
    print("KERNEL_OK")
</pallas_src>

<mosaic_0001>
module attributes {stable_mosaic.version = 11 : i64} {
  func.func @_gating_kernel(%arg0: i32, %arg1: memref<16x32xf32, #tpu.memory_space<vmem>>, %arg2: memref<32x8xf32, #tpu.memory_space<vmem>>, %arg3: memref<16x16xbf16, #tpu.memory_space<vmem>>, %arg4: memref<16x128xf32, #tpu.memory_space<vmem>>) attributes {dimension_semantics = [#tpu.dimension_semantics<parallel>], iteration_bounds = array<i64: 2>, scalar_prefetch = 0 : i64, scratch_operands = 0 : i64, tpu.core_type = #tpu.core_type<tc>, window_params = [{transform_indices = @transform_0, window_bounds = array<i64: 16, 32>}, {pipeline_mode = #tpu.pipeline_mode<synchronous>, transform_indices = @transform_1, window_bounds = array<i64: 32, 8>}, {pipeline_mode = #tpu.pipeline_mode<synchronous>, transform_indices = @transform_2, window_bounds = array<i64: 16, 16>}, {transform_indices = @transform_3, window_bounds = array<i64: 16, 128>}]} {
    %c0 = arith.constant 0 : index
    %c0_0 = arith.constant 0 : index
    %0 = vector.load %arg2[%c0, %c0_0] : memref<32x8xf32, #tpu.memory_space<vmem>>, vector<32x8xf32>
    %c0_1 = arith.constant 0 : index
    %c0_2 = arith.constant 0 : index
    %1 = vector.load %arg3[%c0_1, %c0_2] : memref<16x16xbf16, #tpu.memory_space<vmem>>, vector<16x16xbf16>
    %2 = tpu.iota {dimensions = array<i32: 1>} : vector<16x8xi32>
    %3 = tpu.iota {dimensions = array<i32: 1>} : vector<16x16xi32>
    %4 = tpu.iota {dimensions = array<i32: 1>} : vector<16x128xi32>
    %c0_3 = arith.constant 0 : index
    %c0_4 = arith.constant 0 : index
    %5 = vector.load %arg1[%c0_3, %c0_4] : memref<16x32xf32, #tpu.memory_space<vmem>>, vector<16x32xf32>
    %cst = arith.constant dense<0.000000e+00> : vector<16x8xf32>
    %6 = tpu.matmul %5, %0, %cst {dimension_numbers = #tpu.dot_dimension_numbers<[1], [0], [0], [1], [0, 0, 1, 1], [], []>} : vector<16x32xf32>, vector<32x8xf32>, vector<16x8xf32> -> vector<16x8xf32>
    %cst_5 = arith.constant dense<0xFF800000> : vector<16xf32>
    %7 = vector.multi_reduction <maximumf>, %6, %cst_5 [1] : vector<16x8xf32> to vector<16xf32>
    %8 = vector.shape_cast %7 : vector<16xf32> to vector<16x1xf32>
    %9 = vector.broadcast %8 : vector<16x1xf32> to vector<16x8xf32>
    %10 = arith.subf %6, %9 : vector<16x8xf32>
    %11 = math.exp %10 : vector<16x8xf32>
    %cst_6 = arith.constant dense<0.000000e+00> : vector<16xf32>
    %12 = vector.multi_reduction <add>, %11, %cst_6 [1] : vector<16x8xf32> to vector<16xf32>
    %13 = vector.shape_cast %12 : vector<16xf32> to vector<16x1xf32>
    %14 = vector.broadcast %13 : vector<16x1xf32> to vector<16x8xf32>
    %15 = arith.divf %11, %14 : vector<16x8xf32>
    %cst_7 = arith.constant dense<0xFF800000> : vector<16xf32>
    %16 = vector.multi_reduction <maximumf>, %15, %cst_7 [1] : vector<16x8xf32> to vector<16xf32>
    %17 = vector.shape_cast %16 : vector<16xf32> to vector<16x1xf32>
    %18 = vector.broadcast %17 : vector<16x1xf32> to vector<16x8xf32>
    %19 = arith.cmpf oeq, %15, %18 : vector<16x8xf32>
    %c8_i32 = arith.constant 8 : i32
    %20 = vector.broadcast %c8_i32 : i32 to vector<16x8xi32>
    %21 = arith.select %19, %2, %20 : vector<16x8xi1>, vector<16x8xi32>
    %cst_8 = arith.constant dense<2147483647> : vector<16xi32>
    %22 = vector.multi_reduction <minsi>, %21, %cst_8 [1] : vector<16x8xi32> to vector<16xi32>
    %23 = vector.shape_cast %22 : vector<16xi32> to vector<16x1xi32>
    %24 = vector.broadcast %23 : vector<16x1xi32> to vector<16x8xi32>
    %25 = arith.cmpi eq, %2, %24 : vector<16x8xi32>
    %26 = arith.extui %25 : vector<16x8xi1> to vector<16x8xi32>
    %27 = arith.sitofp %26 : vector<16x8xi32> to vector<16x8xf32>
    %cst_9 = arith.constant 1.000000e+00 : f32
    %28 = vector.broadcast %cst_9 : f32 to vector<16x8xf32>
    %29 = arith.subf %28, %27 : vector<16x8xf32>
    %30 = arith.mulf %15, %29 : vector<16x8xf32>
    %cst_10 = arith.constant dense<0xFF800000> : vector<16xf32>
    %31 = vector.multi_reduction <maximumf>, %30, %cst_10 [1] : vector<16x8xf32> to vector<16xf32>
    %32 = vector.shape_cast %31 : vector<16xf32> to vector<16x1xf32>
    %33 = vector.broadcast %32 : vector<16x1xf32> to vector<16x8xf32>
    %34 = arith.cmpf oeq, %30, %33 : vector<16x8xf32>
    %c8_i32_11 = arith.constant 8 : i32
    %35 = vector.broadcast %c8_i32_11 : i32 to vector<16x8xi32>
    %36 = arith.select %34, %2, %35 : vector<16x8xi1>, vector<16x8xi32>
    %cst_12 = arith.constant dense<2147483647> : vector<16xi32>
    %37 = vector.multi_reduction <minsi>, %36, %cst_12 [1] : vector<16x8xi32> to vector<16xi32>
    %38 = vector.shape_cast %37 : vector<16xi32> to vector<16x1xi32>
    %39 = arith.addf %17, %32 : vector<16x1xf32>
    %cst_13 = arith.constant 9.99999971E-10 : f32
    %40 = vector.broadcast %cst_13 : f32 to vector<16x1xf32>
    %41 = arith.addf %39, %40 : vector<16x1xf32>
    %42 = arith.divf %17, %41 : vector<16x1xf32>
    %43 = arith.addf %42, %32 : vector<16x1xf32>
    %cst_14 = arith.constant 9.99999971E-10 : f32
    %44 = vector.broadcast %cst_14 : f32 to vector<16x1xf32>
    %45 = arith.addf %43, %44 : vector<16x1xf32>
    %46 = arith.divf %32, %45 : vector<16x1xf32>
    %cst_15 = arith.constant 2.000000e-01 : f32
    %47 = vector.broadcast %cst_15 : f32 to vector<16x1xf32>
    %48 = arith.cmpf ogt, %46, %47 : vector<16x1xf32>
    %49 = arith.extui %48 : vector<16x1xi1> to vector<16x1xi32>
    %50 = arith.sitofp %49 : vector<16x1xi32> to vector<16x1xf32>
    %51 = vector.broadcast %38 : vector<16x1xi32> to vector<16x8xi32>
    %52 = arith.cmpi eq, %2, %51 : vector<16x8xi32>
    %cst_16 = arith.constant 0.000000e+00 : f32
    %53 = vector.shape_cast %50 : vector<16x1xf32> to vector<16x1xf32>
    %54 = vector.broadcast %53 : vector<16x1xf32> to vector<16x8xf32>
    %55 = vector.broadcast %cst_16 : f32 to vector<16x8xf32>
    %56 = arith.select %52, %54, %55 : vector<16x8xi1>, vector<16x8xf32>
    %57 = vector.broadcast %23 : vector<16x1xi32> to vector<16x16xi32>
    %58 = arith.cmpi eq, %3, %57 : vector<16x16xi32>
    %cst_17 = arith.constant 1.000000e+00 : f32
    %cst_18 = arith.constant 0.000000e+00 : f32
    %59 = vector.broadcast %cst_17 : f32 to vector<16x16xf32>
    %60 = vector.broadcast %cst_18 : f32 to vector<16x16xf32>
    %61 = arith.select %58, %59, %60 : vector<16x16xi1>, vector<16x16xf32>
    %c8_i32_19 = arith.constant 8 : i32
    %62 = vector.broadcast %c8_i32_19 : i32 to vector<16x1xi32>
    %63 = arith.addi %38, %62 : vector<16x1xi32>
    %64 = vector.broadcast %63 : vector<16x1xi32> to vector<16x16xi32>
    %65 = arith.cmpi eq, %3, %64 : vector<16x16xi32>
    %cst_20 = arith.constant 0.000000e+00 : f32
    %66 = vector.shape_cast %50 : vector<16x1xf32> to vector<16x1xf32>
    %67 = vector.broadcast %66 : vector<16x1xf32> to vector<16x16xf32>
    %68 = vector.broadcast %cst_20 : f32 to vector<16x16xf32>
    %69 = arith.select %65, %67, %68 : vector<16x16xi1>, vector<16x16xf32>
    %70 = arith.addf %61, %69 : vector<16x16xf32>
    %71 = arith.truncf %70 : vector<16x16xf32> to vector<16x16xbf16>
    %cst_21 = arith.constant dense<0.000000e+00> : vector<16x16xf32>
    %72 = tpu.matmul %1, %71, %cst_21 {dimension_numbers = #tpu.dot_dimension_numbers<[1], [0], [0], [1], [0, 0, 1, 1], [], []>} : vector<16x16xbf16>, vector<16x16xbf16>, vector<16x16xf32> -> vector<16x16xf32>
    %73 = vector.extract_strided_slice %72 {offsets = [0, 0], sizes = [16, 8], strides = [1, 1]} : vector<16x16xf32> to vector<16x8xf32>
    %74 = arith.mulf %73, %27 : vector<16x8xf32>
    %cst_22 = arith.constant 4.000000e+00 : f32
    %75 = vector.broadcast %cst_22 : f32 to vector<16x8xf32>
    %76 = arith.cmpf olt, %74, %75 : vector<16x8xf32>
    %77 = arith.extui %76 : vector<16x8xi1> to vector<16x8xi32>
    %78 = arith.sitofp %77 : vector<16x8xi32> to vector<16x8xf32>
    %79 = arith.mulf %27, %78 : vector<16x8xf32>
    %cst_23 = arith.constant dense<0.000000e+00> : vector<16xf32>
    %80 = vector.multi_reduction <add>, %79, %cst_23 [1] : vector<16x8xf32> to vector<16xf32>
    %81 = vector.shape_cast %80 : vector<16xf32> to vector<16x1xf32>
    %cst_24 = arith.constant dense<0.000000e+00> : vector<16xf32>
    %82 = vector.multi_reduction <add>, %74, %cst_24 [1] : vector<16x8xf32> to vector<16xf32>
    %83 = vector.shape_cast %82 : vector<16xf32> to vector<16x1xf32>
    %84 = arith.mulf %42, %81 : vector<16x1xf32>
    %cst_25 = arith.constant dense<0.000000e+00> : vector<8xf32>
    %85 = vector.multi_reduction <add>, %79, %cst_25 [0] : vector<16x8xf32> to vector<8xf32>
    %86 = vector.shape_cast %85 : vector<8xf32> to vector<1x8xf32>
    %87 = vector.extract_strided_slice %72 {offsets = [0, 8], sizes = [16, 8], strides = [1, 1]} : vector<16x16xf32> to vector<16x8xf32>
    %88 = vector.broadcast %86 : vector<1x8xf32> to vector<16x8xf32>
    %89 = arith.addf %87, %88 : vector<16x8xf32>
    %90 = arith.mulf %89, %56 : vector<16x8xf32>
    %cst_26 = arith.constant 4.000000e+00 : f32
    %91 = vector.broadcast %cst_26 : f32 to vector<16x8xf32>
    %92 = arith.cmpf olt, %90, %91 : vector<16x8xf32>
    %93 = arith.extui %92 : vector<16x8xi1> to vector<16x8xi32>
    %94 = arith.sitofp %93 : vector<16x8xi32> to vector<16x8xf32>
    %95 = arith.mulf %56, %94 : vector<16x8xf32>
    %cst_27 = arith.constant dense<0.000000e+00> : vector<16xf32>
    %96 = vector.multi_reduction <add>, %95, %cst_27 [1] : vector<16x8xf32> to vector<16xf32>
    %97 = vector.shape_cast %96 : vector<16xf32> to vector<16x1xf32>
    %cst_28 = arith.constant dense<0.000000e+00> : vector<16xf32>
    %98 = vector.multi_reduction <add>, %90, %cst_28 [1] : vector<16x8xf32> to vector<16xf32>
    %99 = vector.shape_cast %98 : vector<16xf32> to vector<16x1xf32>
    %100 = arith.mulf %46, %97 : vector<16x1xf32>
    %cst_29 = arith.constant 0.000000e+00 : f32
    %101 = vector.broadcast %cst_29 : f32 to vector<16x1xf32>
    %102 = arith.cmpf ogt, %81, %101 : vector<16x1xf32>
    %c4_i32 = arith.constant 4 : i32
    %103 = vector.broadcast %c4_i32 : i32 to vector<16x1xi32>
    %104 = arith.muli %23, %103 : vector<16x1xi32>
    %105 = arith.fptosi %83 : vector<16x1xf32> to vector<16x1xi32>
    %106 = arith.addi %104, %105 : vector<16x1xi32>
    %c-1_i32 = arith.constant -1 : i32
    %107 = vector.broadcast %c-1_i32 : i32 to vector<16x1xi32>
    %108 = arith.select %102, %106, %107 : vector<16x1xi1>, vector<16x1xi32>
    %cst_30 = arith.constant 0.000000e+00 : f32
    %109 = vector.broadcast %cst_30 : f32 to vector<16x1xf32>
    %110 = arith.cmpf ogt, %97, %109 : vector<16x1xf32>
    %c4_i32_31 = arith.constant 4 : i32
    %111 = vector.broadcast %c4_i32_31 : i32 to vector<16x1xi32>
    %112 = arith.muli %38, %111 : vector<16x1xi32>
    %113 = arith.fptosi %99 : vector<16x1xf32> to vector<16x1xi32>
    %114 = arith.addi %112, %113 : vector<16x1xi32>
    %c-1_i32_32 = arith.constant -1 : i32
    %115 = vector.broadcast %c-1_i32_32 : i32 to vector<16x1xi32>
    %116 = arith.select %110, %114, %115 : vector<16x1xi1>, vector<16x1xi32>
    %117 = vector.broadcast %108 : vector<16x1xi32> to vector<16x128xi32>
    %118 = arith.cmpi eq, %4, %117 : vector<16x128xi32>
    %119 = vector.broadcast %116 : vector<16x1xi32> to vector<16x128xi32>
    %120 = arith.cmpi eq, %4, %119 : vector<16x128xi32>
    %cst_33 = arith.constant 0.000000e+00 : f32
    %121 = vector.shape_cast %100 : vector<16x1xf32> to vector<16x1xf32>
    %122 = vector.broadcast %121 : vector<16x1xf32> to vector<16x128xf32>
    %123 = vector.broadcast %cst_33 : f32 to vector<16x128xf32>
    %124 = arith.select %120, %122, %123 : vector<16x128xi1>, vector<16x128xf32>
    %125 = vector.shape_cast %84 : vector<16x1xf32> to vector<16x1xf32>
    %126 = vector.broadcast %125 : vector<16x1xf32> to vector<16x128xf32>
    %127 = arith.select %118, %126, %124 : vector<16x128xi1>, vector<16x128xf32>
    %c0_34 = arith.constant 0 : index
    %c0_35 = arith.constant 0 : index
    %128 = vector.load %arg4[%c0_34, %c0_35] : memref<16x128xf32, #tpu.memory_space<vmem>>, vector<16x128xf32>
    tpu.vector_store %arg4[%c0_34, %c0_35], %127 {strides = array<i32>} : memref<16x128xf32, #tpu.memory_space<vmem>>, vector<16x128xf32>,
    return
  }
  func.func @transform_0(%arg0: i32) -> (i32, i32) {
    %c0_i32 = arith.constant 0 : i32
    %c0_i32_0 = arith.constant 0 : i32
    return %arg0, %c0_i32 : i32, i32
  }
  func.func @transform_1(%arg0: i32) -> (i32, i32) {
    %c0_i32 = arith.constant 0 : i32
    %c0_i32_0 = arith.constant 0 : i32
    %c0_i32_1 = arith.constant 0 : i32
    return %c0_i32, %c0_i32_0 : i32, i32
  }
  func.func @transform_2(%arg0: i32) -> (i32, i32) {
    %c0_i32 = arith.constant 0 : i32
    %c0_i32_0 = arith.constant 0 : i32
    %c0_i32_1 = arith.constant 0 : i32
    return %c0_i32, %c0_i32_0 : i32, i32
  }
  func.func @transform_3(%arg0: i32) -> (i32, i32) {
    %c0_i32 = arith.constant 0 : i32
    %c0_i32_0 = arith.constant 0 : i32
    return %arg0, %c0_i32 : i32, i32
  }
}

</mosaic_0001>

<bundles_post_ra>
// kernel: tpu_custom_call.1
= control target key start
LH: loop header
LB: loop body
LE: loop exit
PB: predicated region body
PF: predicated region fallthrough
CT: control target
= control target key end

     0   :  { %8 = vsyncpa [#allocation3], 0  ;;  %s1117_s0 = inlined_call_operand.vmem [shape: f32[32,32], index: 0, kind: input, shape index: {}]   ;;  %s1118_s1 = inlined_call_operand.vmem [shape: f32[32,8], index: 1, kind: input, shape index: {}]   ;;  %s1119_s2 = inlined_call_operand.vmem [shape: bf16[16,16], index: 2, kind: input, shape index: {}]   ;;  %s1120_s3 = inlined_call_operand.hbm [shape: f32[32,128], index: 3, kind: output, shape index: {}]  }
   0x1   :  { %10 = vsyncpa [#allocation3 + $0x1], 0  ;;  %s883_s12 = smov 0   ;;  %s885_s13 = smov 0  }
   0x2   :  { %s887_s14 = smov 0   ;;  %s889_s15 = smov 0  }
   0x3 LB: > { %s904_s16 = sadd.s32 4294967295, %s855_s15   ;;  %s656_s17 = sadd.s32 4294967294, %s855_s15   ;;  %s855_s15 = sphi %s889_s15, %s1126_s15   ;;  %s851_s14 = sphi %s887_s14, %s1125_s14   ;;  %s847_s13 = sphi %s885_s13, %s1124_s13   ;;  %s843_s12 = sphi %s883_s12, %s1123_s12  }
   0x4   : > { %s908_s18 = sadd.s32 1, %s855_s15   ;;  %s91_s19 = sadd.s32 1, %s851_s14 }
   0x5   : > { %s88_s20 = ssub.s32 %s855_s15, %s908_s18  ;;  %p101_p0 = scmp.ne.s32.totalorder %s851_s14, %s847_s13 }
   0x6   : > { %p89_p1 = scmp.eq.s32.totalorder %s88_s20, 0  ;;  %p102_p2 = scmp.eq.s32.totalorder %s904_s16, 1 }
   0x7   : > { %p107_p3 = scmp.ne.s32.totalorder %s847_s13, %s843_s12  ;;  %p108_p4 = scmp.eq.s32.totalorder %s656_s17, 1 }
   0x8   : > { %s919_s21 = scalar_select %p89_p1, %s851_s14, %s91_s19  }
   0x9   : > { %p921_p5 = por %p102_p2, %p101_p0  ;;  %p925_p6 = por %p108_p4, %p107_p3 }
   0xa   : > { %p659_p7 = scmp.ge.s32.totalorder %s855_s15, 1  ;;  %p141_p8 = scmp.lt.s32.totalorder %s855_s15, 3 }
   0xc   : > { %p142_p9 = pnand %p659_p7, %p141_p8 }
   0xd   : > { %v173_v0 = vld [vmem:[%s1118_s1] sm:$0xff] (!%p142_p9)  ;;  %v174_v1 = vld [vmem:[%s1118_s1 + $0x8] sm:$0xff] (!%p142_p9)  ;;  %v175_v2 = vld [vmem:[%s1118_s1 + $0x10] sm:$0xff] (!%p142_p9)  ;;  %s661_s30 = sshll.u32 (!%p142_p9), %s904_s16, 1  ;;  %vm183_vm0 = vcmask (!%p142_p9), 261120   ;;  %vm265_vm1 = vcmask (!%p142_p9), 64512   ;;  %v179_v30 = vlaneseq (!%p142_p9) }
   0xe   : > { %145 = sbr.rel (%p142_p9) target bundleno = 2097 (0x831), region = 32  ;;  %v706_v3 = vpack.c.bf16 (!%p142_p9), %v174_v1, %v173_v0  ;;  %v176_v4 = vld [vmem:[%s1118_s1 + $0x18] sm:$0xff] (!%p142_p9)  ;;  %p166_p10 = scmp.lt.s32.totalorder (!%p142_p9), %s661_s30, 3  ;;  %v857_v42 = vmov (!%p142_p9), 0.0   ;;  %vm858_vm12 = vmmov (!%p142_p9), 0  }
   0xf   : > { %v710_v5 = vpack.c.bf16 (!%p142_p9), %v176_v4, %v175_v2  ;;  %v953_v31 = vand.u32 (!%p142_p9), 127, %v179_v30  ;;  %700 = vmatprep.subr.bf16.mxu1 (!%p142_p9), %v857_v42  ;;  %702 = vmatprep.mubr.msk.bf16.mxu1 (!%p142_p9), %vm858_vm12, %v857_v42  ;;  %s859_s10 = smov (!%p142_p9), 8   ;;  %s860_s19 = smov (!%p142_p9), 120  }
  0x10   : > { %707 = vmatprep.subr.bf16.mxu0 (!%p142_p9), %v706_v3  ;;  %s162_s20 = sand.u32 (!%p142_p9), 1, %s847_s13   ;;  %s680_s27 = sshll.u32 (!%p142_p9), %s904_s16, 8 }
  0x11   : > { %709 = vmatpush3.bf16.msra.mxu0 (!%p142_p9), %v706_v3  ;;  %s660_s24 = sshll.u32 (!%p142_p9), %s162_s20, 4  ;;  %s1071_s29 = scalar_lea.hbm (!%p142_p9), %s1120_s3, %s680_s27 }
  0x12   : > { %711 = vmatprep.subr.bf16.mxu0 (!%p142_p9), %v710_v5  ;;  %s164_s25 = scalar_lea.vmem (!%p142_p9), [#allocation2], %s660_s24  ;;  %s861_s5 = smov (!%p142_p9), [#allocation2]  }
  0x13   : > { %s594_s26 = sshll.u32 (!%p142_p9), %s164_s25, 4  ;;  %s1065_s26 = int_to_ptr.vmem [resolvable:$true] %s594_s26 }
  0x14   : > { %s793_s4 = scalar_lea.vmem (!%p142_p9), %s1065_s26, 256 }
  0x15   : > { %s1128_s30 = smov (!%p166_p10, %s661_s30), 3  ;;  %713 = vmatpush3.bf16.msra.mxu0 %v710_v5  ;;  %p794_p11 = scmp.ne.s32.totalorder %s1065_s26, %s793_s4 }
  0x16   : > { %s662_s6 = sshll.u32 %s1128_s30, 3  ;;  %s1075_s30 = scalar_lea.sflag [#allocation3], %s162_s20 }
  0x17   : > { %s169_s9 = scalar_lea.vmem %s1117_s0, %s662_s6  ;;  %p795_p12 = pnand %p794_p11, %p921_p5 }
  0x18   : > { %v181_v6 = vld [vmem:[%s169_s9] sm:$0xff]  ;;  %v182_v7 = vld [vmem:[%s169_s9 + $0x8] sm:$0xff]  ;;  %s797_s6 = sshll.u32 %s861_s5, 4  ;;  %s798_s6 = int_to_ptr.vmem [resolvable:$false] %s797_s6 }
  0x19   : > { %697 = vmatprep.mubr.msk.f32.mxu0 %vm183_vm0, %v181_v6  ;;  %p796_p13 = pneg %p795_p12  ;;  %s799_s7 = scalar_lea.vmem %s798_s6, 512 }
  0x1a   : > { %698 = vmatmul.mubr.msk.f32.vlgmr.msra.gmra.mrb[0].mxu0 %vm183_vm0, %v182_v7  ;;  %p800_p0 = scmp.lt.s32.totalorder %s1065_s26, %s798_s6  ;;  %p801_p1 = scmp.lt.s32.totalorder %s799_s7, %s793_s4 }
  0x1c   : > { %p802_p2 = por %p801_p1, %p800_p0 }
  0x1e   : > { %p803_p3 = pnand %p802_p2, %p796_p13 }
  0xed   : > { %v699_v8 = vpop.f32.mrb[0].mxu0 }
  0xee   : > { %v256_v9 = vpop.f32.mrb[1].mxu0  ;;  %v269_v11 = vsel %vm265_vm1, %v699_v8, -inf }
  0xef   : > { %v266_v10 = vsel %vm265_vm1, %v256_v9, -inf }
  0xf0   : > { %267 = vmax.xlane.f32.xlu0 %v266_v10 }
  0xf4   : > { %270 = vmax.xlane.f32.xlu0 %v269_v11 }
 0x17d   : > { %v268_v12 = vpop.xlane.xlu0 %267 }
 0x17e   : > { %v272_v13 = vsub.f32 %v256_v9, %v268_v12 }
 0x180   : > { %v274_v14 = vmul.f32 1.442695, %v272_v13 }
 0x181   : > { %v271_v15 = vpop.xlane.xlu0 %270 }
 0x182   : > { %777 = vpow2.f32 %v274_v14  ;;  %v273_v16 = vsub.f32 %v699_v8, %v271_v15 }
 0x184   : > { %v276_v17 = vmul.f32 1.442695, %v273_v16 }
 0x186   : > { %779 = vpow2.f32 %v276_v17 }
 0x18c   : > { %v778_v18 = vpop.eup %777 }
 0x18d   : > { %v278_v19 = vsel %vm265_vm1, %v778_v18, 0.0 }
 0x18e   : > { %279 = vadd.xlane.f32.xlu1 %v278_v19 }
 0x190   : > { %v780_v20 = vpop.eup %779 }
 0x191   : > { %v281_v21 = vsel %vm265_vm1, %v780_v20, 0.0 }
 0x192   : > { %282 = vadd.xlane.f32.xlu1 %v281_v21 }
 0x21b   : > { %v280_v22 = vpop.xlane.xlu1 %279 }
 0x21c   : > { %781 = vrcp.f32 %v280_v22 }
 0x21f   : > { %v283_v23 = vpop.xlane.xlu1 %282 }
 0x220   : > { %783 = vrcp.f32 %v283_v23 }
 0x226   : > { %v782_v24 = vpop.eup %781 }
 0x227   : > { %v285_v25 = vmul.f32 %v782_v24, %v778_v18 }
 0x229   : > { %v288_v26 = vsel %vm265_vm1, %v285_v25, -inf }
 0x22a   : > { %v784_v27 = vpop.eup %783  ;;  %289 = vmax.xlane.f32.xlu0 %v288_v26 }
 0x22b   : > { %v287_v28 = vmul.f32 %v784_v27, %v780_v20 }
 0x22d   : > { %v291_v29 = vsel %vm265_vm1, %v287_v28, -inf }
 0x22e   : > { %292 = vmax.xlane.f32.xlu1 %v291_v29 }
 0x2b7   : > { %v955_v32 = vpop.xlane.xlu0 %289 }
 0x2b8   : > { %vm294_vm2 = vcmp.eq.f32.partialorder %v285_v25, %v955_v32 }
 0x2b9   : > { %v296_v33 = vsel %vm294_vm2, %v953_v31, 8 }
 0x2ba   : > { %v298_v34 = vsel %vm265_vm1, %v296_v33, 2147483647 }
 0x2bb   : > { %v960_v35 = vpop.xlane.xlu1 %292  ;;  %v300_v36 = vshra.s32 %v298_v34, 16  ;;  %v299_v43 = vand.u32 65535, %v298_v34 }
 0x2bc   : > { %vm295_vm3 = vcmp.eq.f32.partialorder %v287_v28, %v960_v35 }
 0x2bd   : > { %v302_v37 = vcvt.s32.f32 %v300_v36  ;;  %v297_v38 = vsel %vm295_vm3, %v953_v31, 8  ;;  %v301_v45 = vcvt.s32.f32 %v299_v43 }
 0x2be   : > { %v313_v39 = vsel %vm265_vm1, %v297_v38, 2147483647 }
 0x2bf   : > { %303 = vmin.xlane.f32.xlu0 %v302_v37  ;;  %v315_v40 = vshra.s32 %v313_v39, 16  ;;  %v314_v46 = vand.u32 65535, %v313_v39 }
 0x2c1   : > { %v317_v41 = vcvt.s32.f32 %v315_v40  ;;  %v316_v49 = vcvt.s32.f32 %v314_v46 }
 0x2c3   : > { %318 = vmin.xlane.f32.xlu1 %v317_v41 }
 0x34c   : > { %v304_v44 = vpop.xlane.xlu0 %303 }
 0x34d   : > { %vm305_vm4 = vcmp.eq.f32.partialorder %v302_v37, %v304_v44  ;;  %v310_v51 = vcvt.f32.s32 %v304_v44 }
 0x34e   : > { %v306_v47 = vsel %vm305_vm4, %v301_v45, inf  ;;  %vm420_vm4 = vcmask 130048  }
 0x34f   : > { %307 = vmin.xlane.f32.xlu0 %v306_v47  ;;  %v311_v53 = vshll.u32 %v310_v51, 16 }
 0x350   : > { %v319_v48 = vpop.xlane.xlu1 %318 }
 0x351   : > { %vm320_vm5 = vcmp.eq.f32.partialorder %v317_v41, %v319_v48  ;;  %v325_v54 = vcvt.f32.s32 %v319_v48 }
 0x352   : > { %v321_v50 = vsel %vm320_vm5, %v316_v49, inf }
 0x353   : > { %322 = vmin.xlane.f32.xlu1 %v321_v50  ;;  %v326_v58 = vshll.u32 %v325_v54, 16 }
 0x3dc   : > { %v308_v52 = vpop.xlane.xlu0 %307 }
 0x3dd   : > { %v309_v55 = vcvt.f32.s32 %v308_v52 }
 0x3df   : > { %v966_v56 = vadd.s32 %v311_v53, %v309_v55 }
 0x3e0   : > { %v323_v57 = vpop.xlane.xlu1 %322 }
 0x3e1   : > { %vm328_vm6 = vcmp.eq.s32.totalorder %v953_v31, %v966_v56  ;;  %v324_v59 = vcvt.f32.s32 %v323_v57 }
 0x3e2   : > { %v971_v60 = vsel %vm328_vm6, 1.0, %v857_v42 }
 0x3e3   : > { %v973_v61 = vadd.s32 %v326_v58, %v324_v59  ;;  %v334_v62 = vsub.f32 1.0, %v971_v60 }
 0x3e5   : > { %vm329_vm7 = vcmp.eq.s32.totalorder %v953_v31, %v973_v61  ;;  %v336_v63 = vmul.f32 %v334_v62, %v285_v25 }
 0x3e6   : > { %v979_v0 = vsel %vm329_vm7, 1.0, %v857_v42 }
 0x3e7   : > { %v338_v1 = vsel %vm265_vm1, %v336_v63, -inf  ;;  %v335_v2 = vsub.f32 1.0, %v979_v0 }
 0x3e8   : > { %339 = vmax.xlane.f32.xlu0 %v338_v1 }
 0x3e9   : > { %v337_v3 = vmul.f32 %v335_v2, %v287_v28 }
 0x3eb   : > { %v341_v4 = vsel %vm265_vm1, %v337_v3, -inf }
 0x3ec   : > { %342 = vmax.xlane.f32.xlu1 %v341_v4 }
 0x475   : > { %v340_v5 = vpop.xlane.xlu0 %339 }
 0x476   : > { %vm344_vm8 = vcmp.eq.f32.partialorder %v336_v63, %v340_v5  ;;  %v378_v23 = vadd.f32 %v340_v5, %v955_v32 }
 0x477   : > { %v346_v6 = vsel %vm344_vm8, %v953_v31, 8 }
 0x478   : > { %v348_v7 = vsel %vm265_vm1, %v346_v6, 2147483647  ;;  %v380_v25 = vadd.f32 1e-09, %v378_v23 }
 0x479   : > { %v343_v8 = vpop.xlane.xlu1 %342  ;;  %v350_v9 = vshra.s32 %v348_v7, 16  ;;  %v349_v15 = vand.u32 65535, %v348_v7 }
 0x47a   : > { %vm345_vm9 = vcmp.eq.f32.partialorder %v337_v3, %v343_v8  ;;  %v379_v24 = vadd.f32 %v343_v8, %v960_v35  ;;  %785 = vrcp.f32 %v380_v25  ;;  %v776_v3 = vld [vmem:[%s1119_s2] sm:$0xff]  }
 0x47b   : > { %v352_v10 = vcvt.s32.f32 %v350_v9  ;;  %v347_v11 = vsel %vm345_vm9, %v953_v31, 8  ;;  %v351_v17 = vcvt.s32.f32 %v349_v15 }
 0x47c   : > { %v363_v12 = vsel %vm265_vm1, %v347_v11, 2147483647  ;;  %v381_v26 = vadd.f32 1e-09, %v379_v24 }
 0x47d   : > { %353 = vmin.xlane.f32.xlu0 %v352_v10  ;;  %v365_v13 = vshra.s32 %v363_v12, 16  ;;  %v364_v18 = vand.u32 65535, %v363_v12 }
 0x47e   : > { %787 = vrcp.f32 %v381_v26 }
 0x47f   : > { %v367_v14 = vcvt.s32.f32 %v365_v13  ;;  %v366_v21 = vcvt.s32.f32 %v364_v18 }
 0x481   : > { %368 = vmin.xlane.f32.xlu1 %v367_v14 }
 0x484   : > { %v786_v27 = vpop.eup %785 }
 0x485   : > { %v992_v29 = vmul.f32 %v786_v27, %v955_v32 }
 0x487   : > { %v386_v33 = vadd.f32 %v992_v29, %v340_v5 }
 0x488   : > { %v788_v28 = vpop.eup %787 }
 0x489   : > { %v995_v30 = vmul.f32 %v788_v28, %v960_v35  ;;  %v388_v36 = vadd.f32 1e-09, %v386_v33 }
 0x48b   : > { %v387_v34 = vadd.f32 %v995_v30, %v343_v8  ;;  %789 = vrcp.f32 %v388_v36 }
 0x48d   : > { %v389_v37 = vadd.f32 1e-09, %v387_v34 }
 0x48f   : > { %791 = vrcp.f32 %v389_v37 }
 0x495   : > { %v790_v39 = vpop.eup %789 }
 0x496   : > { %v999_v32 = vmul.f32 %v790_v39, %v340_v5 }
 0x498   : > { %vm394_vm13 = vcmp.gt.f32.partialorder %v999_v32, 0.2 }
 0x499   : > { %v792_v40 = vpop.eup %791  ;;  %v667_v53 = vsel %vm394_vm13, 1.0, %v857_v42 }
 0x49a   : > { %v1001_v46 = vmul.f32 %v792_v40, %v343_v8 }
 0x49c   : > { %vm395_vm14 = vcmp.gt.f32.partialorder %v1001_v46, 0.2 }
 0x49d   : > { %v668_v54 = vsel %vm395_vm14, 1.0, %v857_v42 }
 0x50a   : > { %v354_v16 = vpop.xlane.xlu0 %353 }
 0x50b   : > { %vm355_vm10 = vcmp.eq.f32.partialorder %v352_v10, %v354_v16  ;;  %v360_v38 = vcvt.f32.s32 %v354_v16 }
 0x50c   : > { %v356_v19 = vsel %vm355_vm10, %v351_v17, inf }
 0x50d   : > { %357 = vmin.xlane.f32.xlu0 %v356_v19  ;;  %v361_v43 = vshll.u32 %v360_v38, 16 }
 0x50e   : > { %v369_v20 = vpop.xlane.xlu1 %368 }
 0x50f   : > { %vm370_vm11 = vcmp.eq.f32.partialorder %v367_v14, %v369_v20  ;;  %v375_v44 = vcvt.f32.s32 %v369_v20 }
 0x510   : > { %v371_v22 = vsel %vm370_vm11, %v366_v21, inf }
 0x511   : > { %372 = vmin.xlane.f32.xlu1 %v371_v22  ;;  %v376_v48 = vshll.u32 %v375_v44, 16 }
 0x59a   : > { %v358_v41 = vpop.xlane.xlu0 %357 }
 0x59b   : > { %v359_v45 = vcvt.f32.s32 %v358_v41 }
 0x59d   : > { %v1003_v35 = vadd.s32 %v361_v43, %v359_v45 }
 0x59e   : > { %v373_v47 = vpop.xlane.xlu1 %372 }
 0x59f   : > { %v406_v49 = vadd.s32 8, %v1003_v35  ;;  %v374_v50 = vcvt.f32.s32 %v373_v47  ;;  %vm400_vm15 = vcmp.eq.s32.totalorder %v953_v31, %v1003_v35 }
 0x5a0   : > { %v1018_v55 = vsel %vm400_vm15, %v667_v53, 0.0 }
 0x5a1   : > { %v1008_v51 = vadd.s32 %v376_v48, %v374_v50  ;;  %vm408_vm0 = vcmp.eq.s32.totalorder %v953_v31, %v406_v49 }
 0x5a2   : > { %v410_v58 = vsel %vm408_vm0, %v667_v53, 0.0 }
 0x5a3   : > { %v407_v52 = vadd.s32 8, %v1008_v51  ;;  %vm401_vm2 = vcmp.eq.s32.totalorder %v953_v31, %v1008_v51  ;;  %v412_v63 = vadd.f32 %v971_v60, %v410_v58 }
 0x5a4   : > { %v1020_v57 = vsel %vm401_vm2, %v668_v54, 0.0 }
 0x5a5   : > { %v766_v59 = vpack.i.bf16 %v1020_v57, %v1018_v55  ;;  %vm409_vm3 = vcmp.eq.s32.totalorder %v953_v31, %v407_v52 }
 0x5a6   : > { %v411_v62 = vsel %vm409_vm3, %v668_v54, 0.0 }
 0x5a7   : > { %767 = vrot.lane.b32.xlu1 %v766_v59, %s859_s10  ;;  %v413_v1 = vadd.f32 %v979_v0, %v411_v62 }
 0x5a9   : > { %v414_v2 = vpack.c.bf16 %v413_v1, %v412_v63 }
 0x5ab   : > { %701 = vmatpush3.bf16.msra.mxu1 %v414_v2  ;;  %v563_v2 = vmul.u32 4, %v1008_v51 }
 0x5ae   : > { %703 = vmatmul.mubr.msk.bf16.vlgmr.msra.gmra.mrb[0].mxu1 %vm420_vm4, %v776_v3 }
 0x619   : > { %v768_v23 = vpop.permute.xlu1 %767 }
 0x61a   : > { %v770_v24 = vunpack.i.h.bf16 %v768_v23  ;;  %v769_v25 = vunpack.i.l.bf16 %v768_v23 }
 0x681   : > { %v458_v4 = vpop.f32.mrb[0].mxu1 }
 0x682   : > { %v465_v5 = vmul.f32 %v971_v60, %v458_v4  ;;  %v704_v6 = vpop.f32.mrb[1].mxu1 }
 0x683   : > { %v461_v7 = vpop.f32.mrb[2].mxu1 }
 0x684   : > { %vm467_vm5 = vcmp.lt.f32.partialorder %v465_v5, 4.0  ;;  %v466_v8 = vmul.f32 %v979_v0, %v461_v7  ;;  %v705_v9 = vpop.f32.mrb[3].mxu1  ;;  %v481_v37 = vsel %vm265_vm1, %v465_v5, 0.0 }
 0x685   : > { %v671_v10 = vsel %vm467_vm5, 1.0, %v857_v42 }
 0x686   : > { %v473_v11 = vmul.f32 %v671_v10, %v971_v60  ;;  %vm468_vm6 = vcmp.lt.f32.partialorder %v466_v8, 4.0  ;;  %v484_v38 = vsel %vm265_vm1, %v466_v8, 0.0  ;;  %v552_v10 = vmul.u32 4, %v966_v56 }
 0x687   : > { %v672_v12 = vsel %vm468_vm6, 1.0, %v857_v42 }
 0x688   : > { %v474_v13 = vmul.f32 %v672_v12, %v979_v0  ;;  %v475_v14 = vsel %vm265_vm1, %v473_v11, 0.0  ;;  %v553_v11 = vmul.u32 4, %v973_v61 }
 0x68a   : > { %v478_v15 = vsel %vm265_vm1, %v474_v13, 0.0 }
 0x68b   : > { %v489_v16 = vadd.f32 %v478_v15, %v475_v14 }
 0x68d   : > { %v490_v17 = vrot.slane %v489_v16, 4 }
 0x68f   : > { %v491_v18 = vadd.f32 %v490_v17, %v489_v16 }
 0x691   : > { %v492_v19 = vrot.slane %v491_v18, 2 }
 0x693   : > { %v493_v20 = vadd.f32 %v492_v19, %v491_v18 }
 0x695   : > { %v494_v21 = vrot.slane %v493_v20, 1 }
 0x697   : > { %v495_v22 = vadd.f32 %v494_v21, %v493_v20 }
 0x699   : > { %497 = vrot.lane.b32.xlu0 %v495_v22, %s859_s10 }
 0x70b   : > { %v498_v60 = vpop.permute.xlu0 %497 }
 0x70c   : > { %v500_v26 = vadd.f32 %v498_v60, %v458_v4  ;;  %v501_v27 = vadd.f32 %v498_v60, %v461_v7 }
 0x70e   : > { %v510_v0 = vmul.f32 %v769_v25, %v500_v26  ;;  %v511_v28 = vmul.f32 %v770_v24, %v501_v27 }
 0x710   : > { %vm512_vm7 = vcmp.lt.f32.partialorder %v510_v0, 4.0  ;;  %vm513_vm8 = vcmp.lt.f32.partialorder %v511_v28, 4.0  ;;  %536 = vrot.lane.b32.xlu1 %v510_v0, %s860_s19 }
 0x711   : > { %v673_v33 = vsel %vm512_vm7, 1.0, %v857_v42  ;;  %v674_v34 = vsel %vm513_vm8, 1.0, %v857_v42 }
 0x712   : > { %v771_v36 = vpack.i.bf16 %v674_v34, %v673_v33 }
 0x714   : > { %538 = vrot.lane.b32.xlu1 %v511_v28, %s860_s19  ;;  %772 = vrot.lane.b32.xlu0 %v771_v36, %s860_s19 }
 0x733   : > { %482 = vadd.xlane.f32.xlu0 %v481_v37 }
 0x737   : > { %485 = vadd.xlane.f32.xlu0 %v484_v38 }
 0x782   : > { %v537_v39 = vpop.permute.xlu1 %536 }
 0x783   : > { %v542_v40 = vsel %vm265_vm1, %v537_v39, 0.0 }
 0x784   : > { %543 = vadd.xlane.f32.xlu1 %v542_v40 }
 0x786   : > { %v539_v41 = vpop.permute.xlu1 %538  ;;  %v773_v43 = vpop.permute.xlu0 %772 }
 0x787   : > { %v775_v44 = vunpack.i.h.bf16 %v773_v43  ;;  %v774_v45 = vunpack.i.l.bf16 %v773_v43  ;;  %v545_v42 = vsel %vm265_vm1, %v539_v41, 0.0 }
 0x788   : > { %546 = vadd.xlane.f32.xlu0 %v545_v42 }
 0x789   : > { %v527_v47 = vmul.f32 %v775_v44, %v1020_v57  ;;  %v526_v48 = vmul.f32 %v774_v45, %v1018_v55  ;;  %v562_v55 = vmul.u32 4, %v1003_v35 }
 0x78b   : > { %v531_v49 = vsel %vm265_vm1, %v527_v47, 0.0  ;;  %v528_v50 = vsel %vm265_vm1, %v526_v48, 0.0 }
 0x78c   : > { %532 = vadd.xlane.f32.xlu0 %v531_v49  ;;  %529 = vadd.xlane.f32.xlu1 %v528_v50 }
 0x790   : > { %479 = vadd.xlane.f32.xlu0 %v478_v15  ;;  %476 = vadd.xlane.f32.xlu1 %v475_v14 }
 0x7c0   : > { %v483_v52 = vpop.xlane.xlu0 %482 }
 0x7c1   : > { %v714_v59 = vtrunc.f32 %v483_v52 }
 0x7c3   : > { %v715_v4 = vcvt.f32.s32 %v714_v59 }
 0x7c4   : > { %v486_v53 = vpop.xlane.xlu0 %485 }
 0x7c5   : > { %v716_v62 = vtrunc.f32 %v486_v53  ;;  %v556_v14 = vadd.s32 %v715_v4, %v552_v10 }
 0x7c7   : > { %v717_v5 = vcvt.f32.s32 %v716_v62 }
 0x7c9   : > { %v557_v35 = vadd.s32 %v717_v5, %v553_v11 }
 0x811   : > { %v544_v54 = vpop.xlane.xlu1 %543 }
 0x812   : > { %v718_v58 = vtrunc.f32 %v544_v54 }
 0x814   : > { %v719_v57 = vcvt.f32.s32 %v718_v58 }
 0x815   : > { %v547_v63 = vpop.xlane.xlu0 %546 }
 0x816   : > { %v720_v1 = vtrunc.f32 %v547_v63  ;;  %v566_v8 = vadd.s32 %v719_v57, %v562_v55 }
 0x818   : > { %v721_v3 = vcvt.f32.s32 %v720_v1 }
 0x819   : > { %v533_v6 = vpop.xlane.xlu0 %532  ;;  %v530_v7 = vpop.xlane.xlu1 %529 }
 0x81a   : > { %v567_v9 = vadd.s32 %v721_v3, %v563_v2  ;;  %vm561_vm1 = vcmp.gt.f32.partialorder %v533_v6, 0.0  ;;  %vm560_vm9 = vcmp.gt.f32.partialorder %v530_v7, 0.0  ;;  %v548_v51 = vmul.f32 %v530_v7, %v999_v32 }
 0x81b   : > { %v568_v13 = vsel %vm560_vm9, %v566_v8, 4294967295  ;;  %v549_v17 = vmul.f32 %v533_v6, %v1001_v46 }
 0x81c   : > { %v569_v12 = vsel %vm561_vm1, %v567_v9, 4294967295  ;;  %vm572_vm11 = vcmp.eq.s32.totalorder %v953_v31, %v568_v13 }
 0x81d   : > { %vm573_vm10 = vcmp.eq.s32.totalorder %v953_v31, %v569_v12  ;;  %v480_v15 = vpop.xlane.xlu0 %479  ;;  %v477_v16 = vpop.xlane.xlu1 %476  ;;  %v574_v46 = vsel %vm572_vm11, %v548_v51, 0.0 }
 0x81e   : > { %v488_v56 = vmul.f32 %v480_v15, %v995_v30  ;;  %vm551_vm12 = vcmp.gt.f32.partialorder %v480_v15, 0.0  ;;  %v487_v18 = vmul.f32 %v477_v16, %v992_v29  ;;  %vm550_vm13 = vcmp.gt.f32.partialorder %v477_v16, 0.0 }
 0x81f   : > { %v559_v61 = vsel %vm551_vm12, %v557_v35, 4294967295  ;;  %v575_v19 = vsel %vm573_vm10, %v549_v17, 0.0  ;;  %v558_v32 = vsel %vm550_vm13, %v556_v14, 4294967295 }
 0x820   : > { %vm571_vm14 = vcmp.eq.s32.totalorder %v953_v31, %v559_v61  ;;  %vm570_vm15 = vcmp.eq.s32.totalorder %v953_v31, %v558_v32 }
 0x821   : > { %v577_v20 = vsel %vm571_vm14, %v488_v56, %v575_v19  ;;  %v576_v29 = vsel %vm570_vm15, %v487_v18, %v574_v46 }
 0x822   : > { %579 = vst [vmem:[%s164_s25 + $0x8] sm:$0xff] %v577_v20  ;;  %578 = vst [vmem:[%s164_s25] sm:$0xff] %v576_v29 }
 0x823   : > { %806 = shalt.err (!%p803_p3)
}
 0x824   : > { %s807_s8 = scalar_lea.hbm %s1071_s29, 256  ;;  %s811_s17 = scalar_lea.hbm %s1120_s3, 512 }
 0x825   : > { %p808_p4 = scmp.ne.s32.totalorder %s1071_s29, %s807_s8  ;;  %p812_p9 = scmp.lt.u32.totalorder %s1071_s29, %s1120_s3 }
 0x826   : > { %p813_p10 = scmp.lt.u32.totalorder %s811_s17, %s807_s8  ;;  %p815_p12 = scmp.lt.u32.totalorder %s807_s8, %s1071_s29 }
 0x827   : > { %p809_p7 = pnand %p808_p4, %p921_p5 }
 0x828   : > { %p814_p11 = por %p813_p10, %p812_p9 }
 0x829   : > { %p810_p8 = pneg %p809_p7 }
 0x82a   : > { %p816_p13 = por %p815_p12, %p814_p11 }
 0x82c   : > { %p817_p0 = pnand %p816_p13, %p810_p8 }
 0x82e   : > { %820 = shalt.err (!%p817_p0)
}
 0x82f   : > { %s862_s24 = smov 128  }
 0x830   : > { %722 = dma.vmem_to_hbm [thread:$0]  (%p921_p5), %s1065_s26, 256, %s1071_s29, %s1075_s30, %s862_s24, %s862_s24, %s859_s10  }
 0x831 PF: > { %p728_p1 = scmp.ge.s32.totalorder %s855_s15, 2  ;;  %s609_s25 = sand.u32 1, %s843_s12  }
 0x832   : > { %s610_s27 = scalar_lea.sflag [#allocation3], %s609_s25 }
 0x833   : > { %p725_p2 = pnand %p728_p1, %p925_p6 }
 0x835   : > { %838 = dma.done.wait (!%p725_p2), %s610_s27, 256  }
 0x836   : > { %840 = vsyncadd (!%p725_p2), %s610_s27, 4294967040  ;;  %p13_p3 = scmp.ge.s32.totalorder %s908_s18, 4   ;;  %s1123_s12 = smov %s847_s13 }
 0x837   : > { %s1124_s13 = smov %s851_s14  ;;  %s1125_s14 = smov %s919_s21 }
 0x838   : > { %s1126_s15 = smov %s908_s18  ;;  %15 = sbr.rel (!%p13_p3) target bundleno = 3 (0x3), region = 67 }
 0x83f   :  { %615 = vsyncpa [#allocation3], 1 }
 0x840   :  { %617 = vsyncpa [#allocation3 + $0x1], 1 }

</bundles_post_ra>
